<compile_context>
chip_gen: v7x
topology: tpu7x:2x2x1
jax: 0.10.0
libtpu: 0.0.40
codegen_flags: <defaults>
</compile_context>

<pallas_src>
import functools

import jax
import jax.numpy as jnp
import numpy as np
from jax.experimental import pallas as pl
from jax.experimental.pallas import tpu as pltpu

LN_EPS = 1e-5


def _vp_kernel(x_ref, m_ref, cw_ref, cb_ref, g_ref, be_ref, ow_ref, ob_ref, o_ref, h_scr,
               *, n_layers, ksize, mm_dtype):
    """One grid step = block_b batch elements.

    x_ref  : (Bb, T, C)              activations, channel-last
    m_ref  : (1, 1, Bb*T)            mask, lane-dense slab
    cw_ref : (n_layers, k, C, C)     repacked conv weights, cw[l, dk, ci, co] = W_l[co, ci, dk]
    cb_ref : (n_layers, C)           conv biases
    g_ref  : (n_layers, C)           LayerNorm gamma
    be_ref : (n_layers, C)           LayerNorm beta
    ow_ref : (1, C)                  output 1x1 conv weight (row)
    ob_ref : (1,)  [SMEM]            output conv bias scalar
    o_ref  : (1, 1, Bb*T)            output, lane-dense slab
    h_scr  : (Bb, T + 2*pad, C) VMEM scratch; halo rows stay zero ('same' padding)
    """
    bb, T, C = x_ref.shape
    pad = ksize // 2
    M = bb * T

    # Zero the halo rows once per step (layers only rewrite the interior rows, so the
    # zeros serve as Conv1d 'same' padding for every layer) and stage the activations.
    if pad > 0:
        halo_zeros = jnp.zeros((bb, pad, C), jnp.float32)
        h_scr[:, pl.ds(0, pad), :] = halo_zeros
        h_scr[:, pl.ds(pad + T, pad), :] = halo_zeros
    h_scr[:, pl.ds(pad, T), :] = x_ref[...].astype(jnp.float32)

    h = None
    for layer in range(n_layers):
        # ---- Conv1d(C, C, k, padding=k//2): k accumulating MXU matmuls; taps are
        #      plain sublane-offset loads from the halo'd scratch (vld slots). ----
        acc = None
        for dk in range(ksize):
            tap = h_scr[:, pl.ds(dk, T), :].reshape(M, C).astype(mm_dtype)
            d = jnp.dot(tap, cw_ref[layer, dk], preferred_element_type=jnp.float32)
            acc = d if acc is None else acc + d
        acc = acc + cb_ref[pl.ds(layer, 1), :]                       # (1, C) broadcast

        # ---- ReLU (f32, VPU) ----
        h = jnp.maximum(acc, 0.0)

        # ---- LayerNorm over channels: two independent lane reductions ----
        inv_c = 1.0 / C
        mean = jnp.sum(h, axis=-1, keepdims=True) * inv_c
        ex2 = jnp.sum(h * h, axis=-1, keepdims=True) * inv_c
        var = jnp.maximum(ex2 - mean * mean, 0.0)                    # clamp cancellation
        h = (h - mean) * jax.lax.rsqrt(var + LN_EPS)
        h = h * g_ref[pl.ds(layer, 1), :] + be_ref[pl.ds(layer, 1), :]

        # ---- Dropout: identity at inference (eval mode) ----

        if layer + 1 < n_layers:                 # last layer feeds the epilogue directly
            h_scr[:, pl.ds(pad, T), :] = h.reshape(bb, T, C)

    # ---- Output Conv1d(C, 1, 1): NT matmul (1, C) x (M, C)^T -> (1, M); no h.T ----
    y = jax.lax.dot_general(ow_ref[...], h,
                            dimension_numbers=(((1,), (1,)), ((), ())),
                            preferred_element_type=jnp.float32) + ob_ref[0]
    o_ref[0] = (y * m_ref[0]).astype(o_ref.dtype)    # one lane-dense (1, M) masked write


def variance_predictor(x_nct, x_mask, params, *, n_layers, kernel_size,
                       block_b=None, mm_dtype=jnp.float32):
    """x_nct: (B, C, T), x_mask: (B, 1, T)  ->  (B, 1, T), matching the PyTorch module.

    params (PyTorch-style layouts):
      conv_w (L, C, C, k)   per-layer Conv1d.weight (C_out, C_in, k)
      conv_b (L, C), gamma (L, C), beta (L, C)
      out_w  (1, C, 1)      out Conv1d.weight,  out_b (1,)

    mm_dtype: MXU-operand dtype. bfloat16 is valid on v5e/v6e/v7x (accumulation and
    LayerNorm stay f32); keep float32 for the tightest numerics.
    """
    conv_w, conv_b, gamma, beta, out_w, out_b = params
    B, C, T = x_nct.shape
    k = kernel_size
    assert k % 2 == 1, "PyTorch padding=k//2 matches 'same' only for odd kernel_size"
    pad = k // 2

    if block_b is None:
        # Single grid step by default: on v5e/v6e (1 TC) the grid is a purely serial
        # loop, so extra steps at this size are pure ~0.35us/step overhead.  Cap the
        # matmul M dim (block_b*T) at 512 for f32 vreg pressure.  On v7x, pass an
        # explicit block_b giving an even number of steps once per-step compute is
        # well above the step overhead, so both TensorCores get work.
        block_b = 1
        for d in range(1, B + 1):
            if B % d == 0 and d * T <= 512:
                block_b = d
    assert B % block_b == 0, (B, block_b)
    nb = B // block_b
    M = block_b * T

    # Host-side repack (tiny): cw[l, dk, ci, co] = conv_w[l, co, ci, dk]
    cw = jnp.transpose(conv_w, (0, 3, 2, 1)).astype(mm_dtype)        # (L, k, C, C)
    cb = conv_b.astype(jnp.float32)
    g = gamma.astype(jnp.float32)
    be = beta.astype(jnp.float32)
    ow = out_w.reshape(1, C).astype(jnp.float32)
    ob = out_b.reshape(1).astype(jnp.float32)

    # NOTE: at production-scale T, drop this HBM transpose (emit (B,T,C) upstream or use
    # allow_input_fusion), tile T with an extra "parallel" grid axis and a k-1 halo in the
    # index_map, and on v7x budget VMEM against 64 MiB via
    # pltpu.CompilerParams(vmem_limit_bytes=...).  Not needed at these sizes.
    x = jnp.transpose(x_nct, (0, 2, 1))                              # (B, T, C)
    # (B,1,T) -> (nb,1,block_b*T) is the same row-major data: layout-free reshape.
    m = x_mask.reshape(nb, 1, M).astype(x.dtype)

    kernel = functools.partial(_vp_kernel, n_layers=n_layers, ksize=k, mm_dtype=mm_dtype)

    out = pl.pallas_call(
        kernel,
        out_shape=jax.ShapeDtypeStruct((nb, 1, M), x.dtype),
        grid_spec=pltpu.PrefetchScalarGridSpec(
            num_scalar_prefetch=0,
            grid=(nb,),
            in_specs=[
                pl.BlockSpec((block_b, T, C), lambda b: (b, 0, 0)),            # x
                pl.BlockSpec((1, 1, M), lambda b: (b, 0, 0)),                  # mask slab
                pl.BlockSpec((n_layers, k, C, C), lambda b: (0, 0, 0, 0)),     # conv W
                pl.BlockSpec((n_layers, C), lambda b: (0, 0)),                 # conv b
                pl.BlockSpec((n_layers, C), lambda b: (0, 0)),                 # ln gamma
                pl.BlockSpec((n_layers, C), lambda b: (0, 0)),                 # ln beta
                pl.BlockSpec((1, C), lambda b: (0, 0)),                        # out W row
                pl.BlockSpec(memory_space=pltpu.MemorySpace.SMEM),             # out b scalar
            ],
            out_specs=pl.BlockSpec((1, 1, M), lambda b: (b, 0, 0)),
            scratch_shapes=[pltpu.VMEM((block_b, T + 2 * pad, C), jnp.float32)],
        ),
        compiler_params=pltpu.CompilerParams(dimension_semantics=("parallel",)),
    )(x, m, cw, cb, g, be, ow, ob)

    return out.reshape(B, 1, T)                                      # layout-free reshape


def variance_predictor_ref(x_nct, x_mask, params, *, n_layers, kernel_size):
    """Pure-JAX reference mirroring the PyTorch forward (NCT layout throughout)."""
    conv_w, conv_b, gamma, beta, out_w, out_b = params
    k = kernel_size
    pad = k // 2
    B, C, T = x_nct.shape
    h = x_nct
    for l in range(n_layers):
        hp = jnp.pad(h, ((0, 0), (0, 0), (pad, pad)))
        acc = jnp.zeros_like(h)
        for dk in range(k):
            acc = acc + jnp.einsum("oi,bit->bot", conv_w[l, :, :, dk], hp[:, :, dk:dk + T])
        acc = acc + conv_b[l][None, :, None]
        h = jnp.maximum(acc, 0.0)
        mean = jnp.mean(h, axis=1, keepdims=True)
        var = jnp.mean(jnp.square(h - mean), axis=1, keepdims=True)
        h = (h - mean) / jnp.sqrt(var + LN_EPS)
        h = h * gamma[l][None, :, None] + beta[l][None, :, None]
    y = jnp.einsum("oi,bit->bot", out_w[:, :, 0], h) + out_b[None, :, None]
    return y * x_mask


if __name__ == "__main__":
    # Module hyperparams: VariancePredictor(channels=32, n_layers=2, kernel_size=3, dropout=0.5)
    B, C, T = 4, 32, 16
    n_layers, ksize = 2, 3

    key = jax.random.PRNGKey(0)
    ks = jax.random.split(key, 8)

    conv_w = 0.1 * jax.random.normal(ks[0], (n_layers, C, C, ksize), jnp.float32)
    conv_b = 0.1 * jax.random.normal(ks[1], (n_layers, C), jnp.float32)
    gamma = 1.0 + 0.1 * jax.random.normal(ks[2], (n_layers, C), jnp.float32)
    beta = 0.1 * jax.random.normal(ks[3], (n_layers, C), jnp.float32)
    out_w = 0.1 * jax.random.normal(ks[4], (1, C, 1), jnp.float32)
    out_b = 0.1 * jax.random.normal(ks[5], (1,), jnp.float32)
    params = (conv_w, conv_b, gamma, beta, out_w, out_b)

    # Inputs: x in PyTorch NCT layout, x_mask (B, 1, T) sequence-length mask.
    x = jax.random.normal(ks[6], (B, C, T), jnp.float32)
    lens = jnp.array([T, T - 5, T - 2, 7])
    x_mask = (jnp.arange(T)[None, :] < lens[:, None]).astype(jnp.float32)[:, None, :]

    ref = variance_predictor_ref(x, x_mask, params, n_layers=n_layers, kernel_size=ksize)

    # Default blocking: block_b = B -> grid=(1,), single step (best on v5e/v6e at this size).
    out = variance_predictor(x, x_mask, params, n_layers=n_layers, kernel_size=ksize)
    out = jax.block_until_ready(out)
    assert out.shape == (B, 1, T), out.shape
    np.testing.assert_allclose(np.asarray(out), np.asarray(ref), atol=2e-4, rtol=2e-4)

    # Multi-step grid (block_b=2 -> grid=(2,), the v7x-style split) + bf16 MXU operands;
    # f32 accumulation + f32 LayerNorm.  Exercises the halo scratch across grid steps.
    out_bf16 = variance_predictor(x, x_mask, params, n_layers=n_layers, kernel_size=ksize,
                                  block_b=2, mm_dtype=jnp.bfloat16)
    out_bf16 = jax.block_until_ready(out_bf16)
    np.testing.assert_allclose(np.asarray(out_bf16), np.asarray(ref), atol=5e-2, rtol=5e-2)

    print("KERNEL_OK")
</pallas_src>

<mosaic_0001>
module attributes {stable_mosaic.version = 11 : i64} {
  func.func @_vp_kernel(%arg0: i32, %arg1: memref<4x16x32xf32, #tpu.memory_space<vmem>>, %arg2: memref<1x1x64xf32, #tpu.memory_space<vmem>>, %arg3: memref<2x3x32x32xf32, #tpu.memory_space<vmem>>, %arg4: memref<2x32xf32, #tpu.memory_space<vmem>>, %arg5: memref<2x32xf32, #tpu.memory_space<vmem>>, %arg6: memref<2x32xf32, #tpu.memory_space<vmem>>, %arg7: memref<1x32xf32, #tpu.memory_space<vmem>>, %arg8: memref<1xf32, #tpu.memory_space<smem>>, %arg9: memref<1x1x64xf32, #tpu.memory_space<vmem>>, %arg10: memref<4x18x32xf32, #tpu.memory_space<vmem>>) attributes {dimension_semantics = [#tpu.dimension_semantics<parallel>], iteration_bounds = array<i64: 1>, scalar_prefetch = 0 : i64, scratch_operands = 1 : i64, tpu.core_type = #tpu.core_type<tc>, window_params = [{transform_indices = @transform_0, window_bounds = array<i64: 4, 16, 32>}, {transform_indices = @transform_1, window_bounds = array<i64: 1, 1, 64>}, {pipeline_mode = #tpu.pipeline_mode<synchronous>, transform_indices = @transform_2, window_bounds = array<i64: 2, 3, 32, 32>}, {pipeline_mode = #tpu.pipeline_mode<synchronous>, transform_indices = @transform_3, window_bounds = array<i64: 2, 32>}, {pipeline_mode = #tpu.pipeline_mode<synchronous>, transform_indices = @transform_4, window_bounds = array<i64: 2, 32>}, {pipeline_mode = #tpu.pipeline_mode<synchronous>, transform_indices = @transform_5, window_bounds = array<i64: 2, 32>}, {pipeline_mode = #tpu.pipeline_mode<synchronous>, transform_indices = @transform_6, window_bounds = array<i64: 1, 32>}, {transform_indices = @transform_7, window_bounds = array<i64: 1>}, {transform_indices = @transform_8, window_bounds = array<i64: 1, 1, 64>}]} {
    %cst = arith.constant 0.000000e+00 : f32
    %0 = vector.broadcast %cst : f32 to vector<4x1x32xf32>
    %c0 = arith.constant 0 : index
    %c0_0 = arith.constant 0 : index
    %c0_1 = arith.constant 0 : index
    %1 = vector.load %arg10[%c0, %c0_0, %c0_1] : memref<4x18x32xf32, #tpu.memory_space<vmem>>, vector<4x1x32xf32>
    tpu.vector_store %arg10[%c0, %c0_0, %c0_1], %0 {strides = array<i32>} : memref<4x18x32xf32, #tpu.memory_space<vmem>>, vector<4x1x32xf32>,
    %c0_2 = arith.constant 0 : index
    %c17 = arith.constant 17 : index
    %c0_3 = arith.constant 0 : index
    %2 = vector.load %arg10[%c0_2, %c17, %c0_3] : memref<4x18x32xf32, #tpu.memory_space<vmem>>, vector<4x1x32xf32>
    tpu.vector_store %arg10[%c0_2, %c17, %c0_3], %0 {strides = array<i32>} : memref<4x18x32xf32, #tpu.memory_space<vmem>>, vector<4x1x32xf32>,
    %c0_4 = arith.constant 0 : index
    %c0_5 = arith.constant 0 : index
    %c0_6 = arith.constant 0 : index
    %3 = vector.load %arg1[%c0_4, %c0_5, %c0_6] : memref<4x16x32xf32, #tpu.memory_space<vmem>>, vector<4x16x32xf32>
    %c0_7 = arith.constant 0 : index
    %c1 = arith.constant 1 : index
    %c0_8 = arith.constant 0 : index
    %4 = vector.load %arg10[%c0_7, %c1, %c0_8] : memref<4x18x32xf32, #tpu.memory_space<vmem>>, vector<4x16x32xf32>
    tpu.vector_store %arg10[%c0_7, %c1, %c0_8], %3 {strides = array<i32>} : memref<4x18x32xf32, #tpu.memory_space<vmem>>, vector<4x16x32xf32>,
    %c0_9 = arith.constant 0 : index
    %c0_10 = arith.constant 0 : index
    %c0_11 = arith.constant 0 : index
    %5 = vector.load %arg10[%c0_9, %c0_10, %c0_11] : memref<4x18x32xf32, #tpu.memory_space<vmem>>, vector<4x16x32xf32>
    %6 = vector.shape_cast %5 : vector<4x16x32xf32> to vector<64x32xf32>
    %c0_12 = arith.constant 0 : index
    %c0_13 = arith.constant 0 : index
    %c0_14 = arith.constant 0 : index
    %c0_15 = arith.constant 0 : index
    %7 = vector.load %arg3[%c0_12, %c0_13, %c0_14, %c0_15] : memref<2x3x32x32xf32, #tpu.memory_space<vmem>>, vector<1x1x32x32xf32>
    %8 = vector.shape_cast %7 : vector<1x1x32x32xf32> to vector<32x32xf32>
    %cst_16 = arith.constant dense<0.000000e+00> : vector<64x32xf32>
    %9 = tpu.matmul %6, %8, %cst_16 {dimension_numbers = #tpu.dot_dimension_numbers<[1], [0], [0], [1], [0, 0, 1, 1], [], []>} : vector<64x32xf32>, vector<32x32xf32>, vector<64x32xf32> -> vector<64x32xf32>
    %c0_17 = arith.constant 0 : index
    %c1_18 = arith.constant 1 : index
    %c0_19 = arith.constant 0 : index
    %10 = vector.load %arg10[%c0_17, %c1_18, %c0_19] : memref<4x18x32xf32, #tpu.memory_space<vmem>>, vector<4x16x32xf32>
    %11 = vector.shape_cast %10 : vector<4x16x32xf32> to vector<64x32xf32>
    %c0_20 = arith.constant 0 : index
    %c1_21 = arith.constant 1 : index
    %c0_22 = arith.constant 0 : index
    %c0_23 = arith.constant 0 : index
    %12 = vector.load %arg3[%c0_20, %c1_21, %c0_22, %c0_23] : memref<2x3x32x32xf32, #tpu.memory_space<vmem>>, vector<1x1x32x32xf32>
    %13 = vector.shape_cast %12 : vector<1x1x32x32xf32> to vector<32x32xf32>
    %cst_24 = arith.constant dense<0.000000e+00> : vector<64x32xf32>
    %14 = tpu.matmul %11, %13, %cst_24 {dimension_numbers = #tpu.dot_dimension_numbers<[1], [0], [0], [1], [0, 0, 1, 1], [], []>} : vector<64x32xf32>, vector<32x32xf32>, vector<64x32xf32> -> vector<64x32xf32>
    %15 = arith.addf %9, %14 : vector<64x32xf32>
    %c0_25 = arith.constant 0 : index
    %c2 = arith.constant 2 : index
    %c0_26 = arith.constant 0 : index
    %16 = vector.load %arg10[%c0_25, %c2, %c0_26] : memref<4x18x32xf32, #tpu.memory_space<vmem>>, vector<4x16x32xf32>
    %17 = vector.shape_cast %16 : vector<4x16x32xf32> to vector<64x32xf32>
    %c0_27 = arith.constant 0 : index
    %c2_28 = arith.constant 2 : index
    %c0_29 = arith.constant 0 : index
    %c0_30 = arith.constant 0 : index
    %18 = vector.load %arg3[%c0_27, %c2_28, %c0_29, %c0_30] : memref<2x3x32x32xf32, #tpu.memory_space<vmem>>, vector<1x1x32x32xf32>
    %19 = vector.shape_cast %18 : vector<1x1x32x32xf32> to vector<32x32xf32>
    %cst_31 = arith.constant dense<0.000000e+00> : vector<64x32xf32>
    %20 = tpu.matmul %17, %19, %cst_31 {dimension_numbers = #tpu.dot_dimension_numbers<[1], [0], [0], [1], [0, 0, 1, 1], [], []>} : vector<64x32xf32>, vector<32x32xf32>, vector<64x32xf32> -> vector<64x32xf32>
    %21 = arith.addf %15, %20 : vector<64x32xf32>
    %c0_32 = arith.constant 0 : index
    %c0_33 = arith.constant 0 : index
    %22 = vector.load %arg4[%c0_32, %c0_33] : memref<2x32xf32, #tpu.memory_space<vmem>>, vector<1x32xf32>
    %23 = vector.broadcast %22 : vector<1x32xf32> to vector<64x32xf32>
    %24 = arith.addf %21, %23 : vector<64x32xf32>
    %cst_34 = arith.constant 0.000000e+00 : f32
    %25 = vector.broadcast %cst_34 : f32 to vector<64x32xf32>
    %26 = arith.maximumf %24, %25 : vector<64x32xf32>
    %cst_35 = arith.constant dense<0.000000e+00> : vector<64xf32>
    %27 = vector.multi_reduction <add>, %26, %cst_35 [1] : vector<64x32xf32> to vector<64xf32>
    %28 = vector.shape_cast %27 : vector<64xf32> to vector<64x1xf32>
    %cst_36 = arith.constant 3.125000e-02 : f32
    %29 = vector.broadcast %cst_36 : f32 to vector<64x1xf32>
    %30 = arith.mulf %28, %29 : vector<64x1xf32>
    %31 = arith.mulf %26, %26 : vector<64x32xf32>
    %cst_37 = arith.constant dense<0.000000e+00> : vector<64xf32>
    %32 = vector.multi_reduction <add>, %31, %cst_37 [1] : vector<64x32xf32> to vector<64xf32>
    %33 = vector.shape_cast %32 : vector<64xf32> to vector<64x1xf32>
    %cst_38 = arith.constant 3.125000e-02 : f32
    %34 = vector.broadcast %cst_38 : f32 to vector<64x1xf32>
    %35 = arith.mulf %33, %34 : vector<64x1xf32>
    %36 = arith.mulf %30, %30 : vector<64x1xf32>
    %37 = arith.subf %35, %36 : vector<64x1xf32>
    %cst_39 = arith.constant 0.000000e+00 : f32
    %38 = vector.broadcast %cst_39 : f32 to vector<64x1xf32>
    %39 = arith.maximumf %37, %38 : vector<64x1xf32>
    %40 = vector.broadcast %30 : vector<64x1xf32> to vector<64x32xf32>
    %41 = arith.subf %26, %40 : vector<64x32xf32>
    %cst_40 = arith.constant 9.99999974E-6 : f32
    %42 = vector.broadcast %cst_40 : f32 to vector<64x1xf32>
    %43 = arith.addf %39, %42 : vector<64x1xf32>
    %44 = math.rsqrt %43 : vector<64x1xf32>
    %45 = vector.broadcast %44 : vector<64x1xf32> to vector<64x32xf32>
    %46 = arith.mulf %41, %45 : vector<64x32xf32>
    %c0_41 = arith.constant 0 : index
    %c0_42 = arith.constant 0 : index
    %47 = vector.load %arg5[%c0_41, %c0_42] : memref<2x32xf32, #tpu.memory_space<vmem>>, vector<1x32xf32>
    %48 = vector.broadcast %47 : vector<1x32xf32> to vector<64x32xf32>
    %49 = arith.mulf %46, %48 : vector<64x32xf32>
    %c0_43 = arith.constant 0 : index
    %c0_44 = arith.constant 0 : index
    %50 = vector.load %arg6[%c0_43, %c0_44] : memref<2x32xf32, #tpu.memory_space<vmem>>, vector<1x32xf32>
    %51 = vector.broadcast %50 : vector<1x32xf32> to vector<64x32xf32>
    %52 = arith.addf %49, %51 : vector<64x32xf32>
    %53 = vector.shape_cast %52 : vector<64x32xf32> to vector<4x16x32xf32>
    %c0_45 = arith.constant 0 : index
    %c1_46 = arith.constant 1 : index
    %c0_47 = arith.constant 0 : index
    %54 = vector.load %arg10[%c0_45, %c1_46, %c0_47] : memref<4x18x32xf32, #tpu.memory_space<vmem>>, vector<4x16x32xf32>
    tpu.vector_store %arg10[%c0_45, %c1_46, %c0_47], %53 {strides = array<i32>} : memref<4x18x32xf32, #tpu.memory_space<vmem>>, vector<4x16x32xf32>,
    %c0_48 = arith.constant 0 : index
    %c0_49 = arith.constant 0 : index
    %c0_50 = arith.constant 0 : index
    %55 = vector.load %arg10[%c0_48, %c0_49, %c0_50] : memref<4x18x32xf32, #tpu.memory_space<vmem>>, vector<4x16x32xf32>
    %56 = vector.shape_cast %55 : vector<4x16x32xf32> to vector<64x32xf32>
    %c1_51 = arith.constant 1 : index
    %c0_52 = arith.constant 0 : index
    %c0_53 = arith.constant 0 : index
    %c0_54 = arith.constant 0 : index
    %57 = vector.load %arg3[%c1_51, %c0_52, %c0_53, %c0_54] : memref<2x3x32x32xf32, #tpu.memory_space<vmem>>, vector<1x1x32x32xf32>
    %58 = vector.shape_cast %57 : vector<1x1x32x32xf32> to vector<32x32xf32>
    %cst_55 = arith.constant dense<0.000000e+00> : vector<64x32xf32>
    %59 = tpu.matmul %56, %58, %cst_55 {dimension_numbers = #tpu.dot_dimension_numbers<[1], [0], [0], [1], [0, 0, 1, 1], [], []>} : vector<64x32xf32>, vector<32x32xf32>, vector<64x32xf32> -> vector<64x32xf32>
    %c0_56 = arith.constant 0 : index
    %c1_57 = arith.constant 1 : index
    %c0_58 = arith.constant 0 : index
    %60 = vector.load %arg10[%c0_56, %c1_57, %c0_58] : memref<4x18x32xf32, #tpu.memory_space<vmem>>, vector<4x16x32xf32>
    %61 = vector.shape_cast %60 : vector<4x16x32xf32> to vector<64x32xf32>
    %c1_59 = arith.constant 1 : index
    %c1_60 = arith.constant 1 : index
    %c0_61 = arith.constant 0 : index
    %c0_62 = arith.constant 0 : index
    %62 = vector.load %arg3[%c1_59, %c1_60, %c0_61, %c0_62] : memref<2x3x32x32xf32, #tpu.memory_space<vmem>>, vector<1x1x32x32xf32>
    %63 = vector.shape_cast %62 : vector<1x1x32x32xf32> to vector<32x32xf32>
    %cst_63 = arith.constant dense<0.000000e+00> : vector<64x32xf32>
    %64 = tpu.matmul %61, %63, %cst_63 {dimension_numbers = #tpu.dot_dimension_numbers<[1], [0], [0], [1], [0, 0, 1, 1], [], []>} : vector<64x32xf32>, vector<32x32xf32>, vector<64x32xf32> -> vector<64x32xf32>
    %65 = arith.addf %59, %64 : vector<64x32xf32>
    %c0_64 = arith.constant 0 : index
    %c2_65 = arith.constant 2 : index
    %c0_66 = arith.constant 0 : index
    %66 = vector.load %arg10[%c0_64, %c2_65, %c0_66] : memref<4x18x32xf32, #tpu.memory_space<vmem>>, vector<4x16x32xf32>
    %67 = vector.shape_cast %66 : vector<4x16x32xf32> to vector<64x32xf32>
    %c1_67 = arith.constant 1 : index
    %c2_68 = arith.constant 2 : index
    %c0_69 = arith.constant 0 : index
    %c0_70 = arith.constant 0 : index
    %68 = vector.load %arg3[%c1_67, %c2_68, %c0_69, %c0_70] : memref<2x3x32x32xf32, #tpu.memory_space<vmem>>, vector<1x1x32x32xf32>
    %69 = vector.shape_cast %68 : vector<1x1x32x32xf32> to vector<32x32xf32>
    %cst_71 = arith.constant dense<0.000000e+00> : vector<64x32xf32>
    %70 = tpu.matmul %67, %69, %cst_71 {dimension_numbers = #tpu.dot_dimension_numbers<[1], [0], [0], [1], [0, 0, 1, 1], [], []>} : vector<64x32xf32>, vector<32x32xf32>, vector<64x32xf32> -> vector<64x32xf32>
    %71 = arith.addf %65, %70 : vector<64x32xf32>
    %c1_72 = arith.constant 1 : index
    %c0_73 = arith.constant 0 : index
    %72 = vector.load %arg4[%c1_72, %c0_73] : memref<2x32xf32, #tpu.memory_space<vmem>>, vector<1x32xf32>
    %73 = vector.broadcast %72 : vector<1x32xf32> to vector<64x32xf32>
    %74 = arith.addf %71, %73 : vector<64x32xf32>
    %cst_74 = arith.constant 0.000000e+00 : f32
    %75 = vector.broadcast %cst_74 : f32 to vector<64x32xf32>
    %76 = arith.maximumf %74, %75 : vector<64x32xf32>
    %cst_75 = arith.constant dense<0.000000e+00> : vector<64xf32>
    %77 = vector.multi_reduction <add>, %76, %cst_75 [1] : vector<64x32xf32> to vector<64xf32>
    %78 = vector.shape_cast %77 : vector<64xf32> to vector<64x1xf32>
    %cst_76 = arith.constant 3.125000e-02 : f32
    %79 = vector.broadcast %cst_76 : f32 to vector<64x1xf32>
    %80 = arith.mulf %78, %79 : vector<64x1xf32>
    %81 = arith.mulf %76, %76 : vector<64x32xf32>
    %cst_77 = arith.constant dense<0.000000e+00> : vector<64xf32>
    %82 = vector.multi_reduction <add>, %81, %cst_77 [1] : vector<64x32xf32> to vector<64xf32>
    %83 = vector.shape_cast %82 : vector<64xf32> to vector<64x1xf32>
    %cst_78 = arith.constant 3.125000e-02 : f32
    %84 = vector.broadcast %cst_78 : f32 to vector<64x1xf32>
    %85 = arith.mulf %83, %84 : vector<64x1xf32>
    %86 = arith.mulf %80, %80 : vector<64x1xf32>
    %87 = arith.subf %85, %86 : vector<64x1xf32>
    %cst_79 = arith.constant 0.000000e+00 : f32
    %88 = vector.broadcast %cst_79 : f32 to vector<64x1xf32>
    %89 = arith.maximumf %87, %88 : vector<64x1xf32>
    %90 = vector.broadcast %80 : vector<64x1xf32> to vector<64x32xf32>
    %91 = arith.subf %76, %90 : vector<64x32xf32>
    %cst_80 = arith.constant 9.99999974E-6 : f32
    %92 = vector.broadcast %cst_80 : f32 to vector<64x1xf32>
    %93 = arith.addf %89, %92 : vector<64x1xf32>
    %94 = math.rsqrt %93 : vector<64x1xf32>
    %95 = vector.broadcast %94 : vector<64x1xf32> to vector<64x32xf32>
    %96 = arith.mulf %91, %95 : vector<64x32xf32>
    %c1_81 = arith.constant 1 : index
    %c0_82 = arith.constant 0 : index
    %97 = vector.load %arg5[%c1_81, %c0_82] : memref<2x32xf32, #tpu.memory_space<vmem>>, vector<1x32xf32>
    %98 = vector.broadcast %97 : vector<1x32xf32> to vector<64x32xf32>
    %99 = arith.mulf %96, %98 : vector<64x32xf32>
    %c1_83 = arith.constant 1 : index
    %c0_84 = arith.constant 0 : index
    %100 = vector.load %arg6[%c1_83, %c0_84] : memref<2x32xf32, #tpu.memory_space<vmem>>, vector<1x32xf32>
    %101 = vector.broadcast %100 : vector<1x32xf32> to vector<64x32xf32>
    %102 = arith.addf %99, %101 : vector<64x32xf32>
    %c0_85 = arith.constant 0 : index
    %c0_86 = arith.constant 0 : index
    %103 = vector.load %arg7[%c0_85, %c0_86] : memref<1x32xf32, #tpu.memory_space<vmem>>, vector<1x32xf32>
    %cst_87 = arith.constant dense<0.000000e+00> : vector<1x64xf32>
    %104 = tpu.matmul %103, %102, %cst_87 {dimension_numbers = #tpu.dot_dimension_numbers<[1], [1], [0], [0], [0, 0, 1, 0], [], []>} : vector<1x32xf32>, vector<64x32xf32>, vector<1x64xf32> -> vector<1x64xf32>
    %c0_88 = arith.constant 0 : index
    %105 = memref.load %arg8[%c0_88] : memref<1xf32, #tpu.memory_space<smem>>
    %106 = vector.broadcast %105 : f32 to vector<1x64xf32>
    %107 = arith.addf %104, %106 : vector<1x64xf32>
    %c0_89 = arith.constant 0 : index
    %c0_90 = arith.constant 0 : index
    %c0_91 = arith.constant 0 : index
    %108 = vector.load %arg2[%c0_89, %c0_90, %c0_91] : memref<1x1x64xf32, #tpu.memory_space<vmem>>, vector<1x1x64xf32>
    %109 = vector.shape_cast %108 : vector<1x1x64xf32> to vector<1x64xf32>
    %110 = arith.mulf %107, %109 : vector<1x64xf32>
    %c0_92 = arith.constant 0 : index
    %c0_93 = arith.constant 0 : index
    %c0_94 = arith.constant 0 : index
    %111 = vector.load %arg9[%c0_92, %c0_93, %c0_94] : memref<1x1x64xf32, #tpu.memory_space<vmem>>, vector<1x1x64xf32>
    %112 = vector.shape_cast %111 : vector<1x1x64xf32> to vector<1x64xf32>
    %113 = vector.shape_cast %110 : vector<1x64xf32> to vector<1x1x64xf32>
    tpu.vector_store %arg9[%c0_92, %c0_93, %c0_94], %113 {strides = array<i32>} : memref<1x1x64xf32, #tpu.memory_space<vmem>>, vector<1x1x64xf32>,
    return
  }
  func.func @transform_0(%arg0: i32) -> (i32, i32, i32) {
    %c0_i32 = arith.constant 0 : i32
    %c0_i32_0 = arith.constant 0 : i32
    %c0_i32_1 = arith.constant 0 : i32
    return %arg0, %c0_i32, %c0_i32_0 : i32, i32, i32
  }
  func.func @transform_1(%arg0: i32) -> (i32, i32, i32) {
    %c0_i32 = arith.constant 0 : i32
    %c0_i32_0 = arith.constant 0 : i32
    %c0_i32_1 = arith.constant 0 : i32
    return %arg0, %c0_i32, %c0_i32_0 : i32, i32, i32
  }
  func.func @transform_2(%arg0: i32) -> (i32, i32, i32, i32) {
    %c0_i32 = arith.constant 0 : i32
    %c0_i32_0 = arith.constant 0 : i32
    %c0_i32_1 = arith.constant 0 : i32
    %c0_i32_2 = arith.constant 0 : i32
    %c0_i32_3 = arith.constant 0 : i32
    return %c0_i32, %c0_i32_0, %c0_i32_1, %c0_i32_2 : i32, i32, i32, i32
  }
  func.func @transform_3(%arg0: i32) -> (i32, i32) {
    %c0_i32 = arith.constant 0 : i32
    %c0_i32_0 = arith.constant 0 : i32
    %c0_i32_1 = arith.constant 0 : i32
    return %c0_i32, %c0_i32_0 : i32, i32
  }
  func.func @transform_4(%arg0: i32) -> (i32, i32) {
    %c0_i32 = arith.constant 0 : i32
    %c0_i32_0 = arith.constant 0 : i32
    %c0_i32_1 = arith.constant 0 : i32
    return %c0_i32, %c0_i32_0 : i32, i32
  }
  func.func @transform_5(%arg0: i32) -> (i32, i32) {
    %c0_i32 = arith.constant 0 : i32
    %c0_i32_0 = arith.constant 0 : i32
    %c0_i32_1 = arith.constant 0 : i32
    return %c0_i32, %c0_i32_0 : i32, i32
  }
  func.func @transform_6(%arg0: i32) -> (i32, i32) {
    %c0_i32 = arith.constant 0 : i32
    %c0_i32_0 = arith.constant 0 : i32
    %c0_i32_1 = arith.constant 0 : i32
    return %c0_i32, %c0_i32_0 : i32, i32
  }
  func.func @transform_7(%arg0: i32) -> i32 {
    %c0_i32 = arith.constant 0 : i32
    %c0_i32_0 = arith.constant 0 : i32
    return %c0_i32 : i32
  }
  func.func @transform_8(%arg0: i32) -> (i32, i32, i32) {
    %c0_i32 = arith.constant 0 : i32
    %c0_i32_0 = arith.constant 0 : i32
    %c0_i32_1 = arith.constant 0 : i32
    return %arg0, %c0_i32, %c0_i32_0 : i32, i32, i32
  }
}

</mosaic_0001>

<bundles_post_ra>
// kernel: tpu_custom_call.1
= control target key start
LH: loop header
LB: loop body
LE: loop exit
PB: predicated region body
PF: predicated region fallthrough
CT: control target
= control target key end

     0   :  { %14 = vsyncpa [#allocation5], 0  ;;  %s2355_s0 = inlined_call_operand.hbm [shape: f32[4,16,32], index: 0, kind: input, shape index: {}]   ;;  %s2356_s1 = inlined_call_operand.vmem [shape: f32[1,1,64], index: 1, kind: input, shape index: {}]   ;;  %s2357_s2 = inlined_call_operand.hbm [shape: f32[2,3,32,32], index: 2, kind: input, shape index: {}]   ;;  %s2358_s3 = inlined_call_operand.vmem [shape: f32[2,32], index: 3, kind: input, shape index: {}]   ;;  %s2359_s4 = inlined_call_operand.vmem [shape: f32[2,32], index: 4, kind: input, shape index: {}]   ;;  %s2360_s5 = inlined_call_operand.vmem [shape: f32[2,32], index: 5, kind: input, shape index: {}]   ;;  %s2361_s6 = inlined_call_operand.vmem [shape: f32[1,32], index: 6, kind: input, shape index: {}]   ;;  %s2362_s7 = inlined_call_operand.<no memory space> [shape: f32[1], index: 7, kind: input, shape index: {}]   ;;  %s2363_s8 = inlined_call_operand.hbm [shape: f32[1,1,64], index: 8, kind: output, shape index: {}]  }
   0x1   :  { %15 = vsyncpa [#allocation8], 0 }
   0x2   :  { %16 = vsyncpa [#allocation6], 0  ;;  %s1925_s27 = smov [#allocation4]   ;;  %s1853_s9 = scalar_lea.hbm %s2355_s0, 1024 }
   0x3   :  { %s22_s28 = sshll.u32 %s1925_s27, 4  ;;  %p1854_p0 = scmp.ne.s32.totalorder %s2355_s0, %s1853_s9  ;;  %s23_s28 = int_to_ptr.vmem [resolvable:$true] %s22_s28 }
   0x4   :  { %p1857_p1 = scmp.lt.u32.totalorder %s1853_s9, %s2355_s0 }
   0x6   :  { %p1859_p2 = pnand %p1857_p1, %p1854_p0 }
   0x8   :  { %1862 = shalt.err (!%p1859_p2)
}
   0x9   :  { %s1863_s14 = scalar_lea.vmem %s23_s28, 1024  ;;  %p1868_p4 = scmp.lt.s32.totalorder %s23_s28, %s23_s28 }
   0xa   :  { %p1864_p3 = scmp.ne.s32.totalorder %s23_s28, %s1863_s14  ;;  %p1869_p5 = scmp.lt.s32.totalorder %s1863_s14, %s1863_s14 }
   0xc   :  { %p1870_p6 = por %p1869_p5, %p1868_p4 }
   0xe   :  { %p1871_p7 = pnand %p1870_p6, %p1864_p3 }
  0x10   :  { %1874 = shalt.err (!%p1871_p7)
}
  0x11   :  { %s1926_s15 = smov 128   ;;  %s1927_s16 = smov 8  }
  0x12   :  { %28 = dma.hbm_to_vmem [thread:$0]  %s2355_s0, 1024, %s23_s28, [#allocation5], %s1926_s15, %s1926_s15, %s1927_s16  }
  0x13   :  { %s1928_s19 = smov [#allocation7]   ;;  %s1875_s23 = scalar_lea.hbm %s2357_s2, 3072 }
  0x14   :  { %s36_s20 = sshll.u32 %s1928_s19, 4  ;;  %p1876_p8 = scmp.ne.s32.totalorder %s2357_s2, %s1875_s23  ;;  %s37_s20 = int_to_ptr.vmem [resolvable:$true] %s36_s20 }
  0x15   :  { %p1879_p9 = scmp.lt.u32.totalorder %s1875_s23, %s2357_s2 }
  0x17   :  { %p1881_p10 = pnand %p1879_p9, %p1876_p8 }
  0x19   :  { %1884 = shalt.err (!%p1881_p10)
}
  0x1a   :  { %s1885_s29 = scalar_lea.vmem %s37_s20, 3072  ;;  %p1890_p12 = scmp.lt.s32.totalorder %s37_s20, %s37_s20 }
  0x1b   :  { %p1886_p11 = scmp.ne.s32.totalorder %s37_s20, %s1885_s29  ;;  %p1891_p13 = scmp.lt.s32.totalorder %s1885_s29, %s1885_s29 }
  0x1d   :  { %p1892_p0 = por %p1891_p13, %p1890_p12 }
  0x1f   :  { %p1893_p1 = pnand %p1892_p0, %p1886_p11 }
  0x21   :  { %1896 = shalt.err (!%p1893_p1)
}
  0x22   :  { %42 = dma.hbm_to_vmem [thread:$0]  %s2357_s2, 3072, %s37_s20, [#allocation8], %s1926_s15, %s1926_s15, %s1927_s16  }
  0x23   :  { %1919 = dma.done.wait [#allocation5], 1024  }
  0x24   :  { %1920 = vsyncadd [#allocation5], 4294966272 }
  0x25   :  { %1921 = dma.done.wait [#allocation8], 3072  }
  0x26   :  { %1922 = vsyncadd [#allocation8], 4294964224  ;;  %vm59_vm0 = vcmask 253952   ;;  %v1929_v0 = vmov 0.0   ;;  %vm76_vm1 = vcmask 261120   ;;  %v106_v1 = vld [vmem:[#allocation7 + $0x20] sm:$0xff] }
  0x27   :  { %60 = vst.msk [vmem:[#allocation2] sm:$0x1] %vm59_vm0, %v1929_v0  ;;  %61 = vst.msk [vmem:[#allocation2 + $0x18] sm:$0x1] %vm59_vm0, %v1929_v0  ;;  %v107_v2 = vld [vmem:[#allocation7 + $0x28] sm:$0xff]  ;;  %v108_v3 = vld [vmem:[#allocation7 + $0x30] sm:$0xff] }
  0x28   :  { %62 = vst.msk [vmem:[#allocation2 + $0x30] sm:$0x1] %vm59_vm0, %v1929_v0  ;;  %63 = vst.msk [vmem:[#allocation2 + $0x48] sm:$0x1] %vm59_vm0, %v1929_v0  ;;  %v1713_v4 = vpack.c.bf16 %v107_v2, %v106_v1  ;;  %v109_v5 = vld [vmem:[#allocation7 + $0x38] sm:$0xff]  ;;  %v68_v6 = vld [vmem:[#allocation4] sm:$0xff] }
  0x29   :  { %64 = vst.msk [vmem:[#allocation2 + $0x11] sm:$0x1] %vm59_vm0, %v1929_v0  ;;  %65 = vst.msk [vmem:[#allocation2 + $0x29] sm:$0x1] %vm59_vm0, %v1929_v0  ;;  %v69_v7 = vld [vmem:[#allocation4 + $0x8] sm:$0xff]  ;;  %v1717_v8 = vpack.c.bf16 %v109_v5, %v108_v3  ;;  %v93_v9 = vld [vmem:[#allocation7] sm:$0xff] }
  0x2a   :  { %66 = vst.msk [vmem:[#allocation2 + $0x41] sm:$0x1] %vm59_vm0, %v1929_v0  ;;  %67 = vst.msk [vmem:[#allocation2 + $0x59] sm:$0x1] %vm59_vm0, %v1929_v0  ;;  %v94_v10 = vld [vmem:[#allocation7 + $0x8] sm:$0xff]  ;;  %v70_v11 = vld [vmem:[#allocation4 + $0x10] sm:$0xff]  ;;  %1714 = vmatprep.subr.bf16.mxu0 %v1713_v4  ;;  %1777 = vmatprep.subr.bf16.mxu1 %v1713_v4 }
  0x2b   :  { %77 = vst.msk [vmem:[#allocation2 + $0x1] sm:$0xff] %vm76_vm1, %v68_v6  ;;  %78 = vst.msk [vmem:[#allocation2 + $0x9] sm:$0xff] %vm76_vm1, %v69_v7  ;;  %v71_v12 = vld [vmem:[#allocation4 + $0x18] sm:$0xff]  ;;  %1716 = vmatpush3.bf16.msra.mxu0 %v1713_v4  ;;  %v72_v13 = vld [vmem:[#allocation4 + $0x20] sm:$0xff]  ;;  %1779 = vmatpush3.bf16.msra.mxu1 %v1713_v4  ;;  %v1721_v14 = vpack.c.bf16 %v94_v10, %v93_v9  ;;  %vm1931_vm2 = vmmov 0   ;;  %s1932_s22 = smov [#allocation9]  }
  0x2c   :  { %79 = vst.msk [vmem:[#allocation2 + $0x19] sm:$0xff] %vm76_vm1, %v70_v11  ;;  %80 = vst.msk [vmem:[#allocation2 + $0x21] sm:$0xff] %vm76_vm1, %v71_v12  ;;  %1718 = vmatprep.subr.bf16.mxu0 %v1717_v8  ;;  %v95_v15 = vld [vmem:[#allocation7 + $0x10] sm:$0xff]  ;;  %v73_v16 = vld [vmem:[#allocation4 + $0x28] sm:$0xff]  ;;  %1778 = vmatprep.subr.bf16.mxu1 %v1717_v8  ;;  %s1420_s23 = sshll.u32 %s1932_s22, 4  ;;  %vm1412_vm4 = vcmask 516096   ;;  %s1421_s23 = int_to_ptr.vmem [resolvable:$true] %s1420_s23 }
  0x2d   :  { %81 = vst.msk [vmem:[#allocation2 + $0x31] sm:$0xff] %vm76_vm1, %v72_v13  ;;  %v96_v17 = vld [vmem:[#allocation7 + $0x18] sm:$0xff]  ;;  %82 = vst.msk [vmem:[#allocation2 + $0x39] sm:$0xff] %vm76_vm1, %v73_v16  ;;  %v74_v18 = vld [vmem:[#allocation4 + $0x30] sm:$0xff]  ;;  %s1901_s24 = scalar_lea.vmem %s1421_s23, 32  ;;  %p1902_p3 = scmp.lt.s32.totalorder %s1421_s23, %s1421_s23 }
  0x2e   :  { %v75_v19 = vld [vmem:[#allocation4 + $0x38] sm:$0xff]  ;;  %83 = vst.msk [vmem:[#allocation2 + $0x49] sm:$0xff] %vm76_vm1, %v74_v18  ;;  %v1725_v22 = vpack.c.bf16 %v96_v17, %v95_v15  ;;  %v377_v24 = vld [vmem:[#allocation7 + $0x40] sm:$0xff]  ;;  %v378_v25 = vld [vmem:[#allocation7 + $0x48] sm:$0xff] }
  0x2f   :  { %84 = vst.msk [vmem:[#allocation2 + $0x51] sm:$0xff] %vm76_vm1, %v75_v19  ;;  %1720 = vmatpush3.bf16.msra.mxu0 %v1717_v8  ;;  %1780 = vmatpush3.bf16.msra.mxu1 %v1717_v8  ;;  %v1729_v28 = vpack.c.bf16 %v378_v25, %v377_v24  ;;  %v379_v30 = vld [vmem:[#allocation7 + $0x50] sm:$0xff]  ;;  %v380_v31 = vld [vmem:[#allocation7 + $0x58] sm:$0xff]  ;;  %v1454_v55 = vld [vmem:[%s2358_s3] ss:$0 sm:$0xff] }
  0x30   :  { %1722 = vmatprep.subr.bf16.mxu0 %v1721_v14  ;;  %v1733_v36 = vpack.c.bf16 %v380_v31, %v379_v30  ;;  %vm2298_vm3 = vmpackc.low %vm76_vm1, %vm76_vm1 }
  0x32   :  { %v97_v20 = vld [vmem:[#allocation2 + $0x1] sm:$0xff]  ;;  %v98_v21 = vld [vmem:[#allocation2 + $0x9] sm:$0xff] }
  0x33   :  { %1582 = vmatprep.mubr.msk.f32.mxu0 %vm76_vm1, %v97_v20  ;;  %v99_v23 = vld [vmem:[#allocation2 + $0x19] sm:$0xff]  ;;  %v100_v26 = vld [vmem:[#allocation2 + $0x21] sm:$0xff]  ;;  %v369_v44 = vld [vmem:[#allocation2 + $0xa] sm:$0xff] }
  0x34   :  { %1583 = vmatmul.mubr.msk.f32.vlgmr.msra.gmra.mrb[0].mxu0 %vm76_vm1, %v98_v21  ;;  %v85_v27 = vld [vmem:[#allocation2] sm:$0xff]  ;;  %v101_v29 = vld [vmem:[#allocation2 + $0x31] sm:$0xff]  ;;  %v86_v34 = vld [vmem:[#allocation2 + $0x8] sm:$0xff] }
  0x35   :  { %1724 = vmatpush3.bf16.msra.mxu0 %v1721_v14  ;;  %1585 = vmatprep.mubr.msk.f32.mxu0 %vm76_vm1, %v99_v23  ;;  %v102_v32 = vld [vmem:[#allocation2 + $0x39] sm:$0xff]  ;;  %v103_v33 = vld [vmem:[#allocation2 + $0x49] sm:$0xff] }
  0x36   :  { %1726 = vmatprep.subr.bf16.mxu0 %v1725_v22  ;;  %1588 = vmatprep.mubr.msk.f32.mxu1 %vm76_vm1, %v101_v29  ;;  %v87_v35 = vld [vmem:[#allocation2 + $0x18] sm:$0xff]  ;;  %v88_v38 = vld [vmem:[#allocation2 + $0x20] sm:$0xff]  ;;  %v89_v39 = vld [vmem:[#allocation2 + $0x30] sm:$0xff] }
  0x37   :  { %1589 = vmatmul.mubr.msk.f32.vlgmr.msra.gmra.mrb[0].mxu1 %vm76_vm1, %v102_v32  ;;  %v104_v37 = vld [vmem:[#allocation2 + $0x51] sm:$0xff]  ;;  %v91_v41 = vld [vmem:[#allocation2 + $0x48] sm:$0xff]  ;;  %v370_v45 = vld [vmem:[#allocation2 + $0x1a] sm:$0xff] }
  0x38   :  { %1586 = vmatmul.mubr.msk.f32.gmra.mrb[2].mxu0 %vm76_vm1, %v100_v26  ;;  %1591 = vmatprep.mubr.msk.f32.mxu1 %vm76_vm1, %v103_v33  ;;  %v90_v40 = vld [vmem:[#allocation2 + $0x38] sm:$0xff]  ;;  %v92_v42 = vld [vmem:[#allocation2 + $0x50] sm:$0xff]  ;;  %v368_v43 = vld [vmem:[#allocation2 + $0x2] sm:$0xff] }
  0x39   :  { %1728 = vmatpush3.bf16.msra.mxu0 %v1725_v22  ;;  %1602 = vmatprep.mubr.msk.f32.mxu0 %vm76_vm1, %v85_v27  ;;  %v371_v46 = vld [vmem:[#allocation2 + $0x22] sm:$0xff]  ;;  %v372_v47 = vld [vmem:[#allocation2 + $0x32] sm:$0xff]  ;;  %v373_v48 = vld [vmem:[#allocation2 + $0x3a] sm:$0xff] }
  0x3a   :  { %1730 = vmatprep.subr.bf16.mxu0 %v1729_v28  ;;  %v374_v49 = vld [vmem:[#allocation2 + $0x4a] sm:$0xff]  ;;  %v375_v50 = vld [vmem:[#allocation2 + $0x52] sm:$0xff] }
  0x3b   :  { %1592 = vmatmul.mubr.msk.f32.gmra.mrb[2].mxu1 %vm76_vm1, %v104_v37 }
  0x3c   :  { %1603 = vmatmul.mubr.msk.f32.vlgmr.msra.gmra.mrb[0].mxu0 %vm76_vm1, %v86_v34 }
  0x3d   :  { %1732 = vmatpush3.bf16.msra.mxu0 %v1729_v28  ;;  %1605 = vmatprep.mubr.msk.f32.mxu0 %vm76_vm1, %v87_v35 }
  0x3e   :  { %1734 = vmatprep.subr.bf16.mxu0 %v1733_v36 }
  0x40   :  { %1606 = vmatmul.mubr.msk.f32.gmra.mrb[2].mxu0 %vm76_vm1, %v88_v38 }
  0x41   :  { %1608 = vmatprep.mubr.msk.f32.mxu0 %vm76_vm1, %v89_v39  ;;  %1736 = vmatpush3.bf16.msra.mxu0 %v1733_v36 }
  0x44   :  { %1609 = vmatmul.mubr.msk.f32.gmra.mrb[4].mxu0 %vm76_vm1, %v90_v40 }
  0x45   :  { %1611 = vmatprep.mubr.msk.f32.mxu0 %vm76_vm1, %v91_v41 }
  0x48   :  { %1612 = vmatmul.mubr.msk.f32.gmra.mrb[6].mxu0 %vm76_vm1, %v92_v42 }
  0x49   :  { %1622 = vmatprep.mubr.msk.f32.mxu0 %vm76_vm1, %v368_v43 }
  0x4c   :  { %1623 = vmatmul.mubr.msk.f32.vlgmr.msra.gmra.mrb[0].mxu0 %vm76_vm1, %v369_v44 }
  0x4d   :  { %1625 = vmatprep.mubr.msk.f32.mxu0 %vm76_vm1, %v370_v45  ;;  %v723_v45 = vld [vmem:[#allocation7 + $0x80] sm:$0xff] }
  0x50   :  { %1626 = vmatmul.mubr.msk.f32.gmra.mrb[2].mxu0 %vm76_vm1, %v371_v46  ;;  %v724_v46 = vld [vmem:[#allocation7 + $0x88] sm:$0xff] }
  0x51   :  { %1628 = vmatprep.mubr.msk.f32.mxu0 %vm76_vm1, %v372_v47  ;;  %v1737_v47 = vpack.c.bf16 %v724_v46, %v723_v45 }
  0x53   :  { %1738 = vmatprep.subr.bf16.mxu1 %v1737_v47 }
  0x54   :  { %1629 = vmatmul.mubr.msk.f32.gmra.mrb[4].mxu0 %vm76_vm1, %v373_v48  ;;  %1740 = vmatpush3.bf16.msra.mxu1 %v1737_v47  ;;  %v725_v48 = vld [vmem:[#allocation7 + $0x90] sm:$0xff] }
  0x55   :  { %1631 = vmatprep.mubr.msk.f32.mxu0 %vm76_vm1, %v374_v49  ;;  %v726_v49 = vld [vmem:[#allocation7 + $0x98] sm:$0xff] }
  0x58   :  { %1632 = vmatmul.mubr.msk.f32.gmra.mrb[6].mxu0 %vm76_vm1, %v375_v50  ;;  %v1741_v50 = vpack.c.bf16 %v726_v49, %v725_v48 }
  0x59   :  { %1710 = vmatprep.mubr.msk.f32.mxu0 %vm1931_vm2, %v1929_v0 }
  0x5a   :  { %1742 = vmatprep.subr.bf16.mxu1 %v1741_v50 }
  0x5b   :  { %1744 = vmatpush3.bf16.msra.mxu1 %v1741_v50 }
 0x10a   :  { %v1590_v51 = vpop.f32.mrb[0].mxu1 }
 0x10b   :  { %v220_v52 = vpop.f32.mrb[1].mxu1 }
 0x10e   :  { %v1593_v53 = vpop.f32.mrb[2].mxu1 }
 0x10f   :  { %v230_v54 = vpop.f32.mrb[3].mxu1 }
 0x11f   :  { %v1624_v56 = vpop.f32.mrb[0].mxu0 }
 0x120   :  { %v524_v57 = vadd.f32 %v1624_v56, %v1454_v55  ;;  %v471_v58 = vpop.f32.mrb[1].mxu0 }
 0x121   :  { %v523_v59 = vadd.f32 %v1454_v55, %v471_v58 }
 0x122   :  { %v2045_v60 = vmax.f32 %v524_v57, 0.0 }
 0x123   :  { %v2047_v61 = vmax.f32 %v523_v59, 0.0  ;;  %v1627_v62 = vpop.f32.mrb[2].mxu0 }
 0x124   :  { %v481_v63 = vpop.f32.mrb[3].mxu0  ;;  %v542_v1 = vsel %vm76_vm1, %v2045_v60, 0.0  ;;  %v572_v2 = vmul.f32 %v2045_v60, %v2045_v60  ;;  %v526_v4 = vadd.f32 %v1627_v62, %v1454_v55 }
 0x125   :  { %v525_v3 = vadd.f32 %v1454_v55, %v481_v63  ;;  %543 = vadd.xlane.f32.xlu0 %v542_v1  ;;  %v571_v6 = vmul.f32 %v2047_v61, %v2047_v61  ;;  %v539_v11 = vsel %vm76_vm1, %v2047_v61, 0.0 }
 0x126   :  { %v582_v5 = vsel %vm76_vm1, %v572_v2, 0.0  ;;  %v2060_v13 = vmax.f32 %v526_v4, 0.0 }
 0x127   :  { %583 = vadd.xlane.f32.xlu1 %v582_v5  ;;  %v1630_v7 = vpop.f32.mrb[4].mxu0  ;;  %v2056_v8 = vmax.f32 %v525_v3, 0.0  ;;  %v579_v14 = vsel %vm76_vm1, %v571_v6, 0.0 }
 0x128   :  { %v1781_v9 = vadd.f32 %v1630_v7, %v1590_v51  ;;  %v491_v10 = vpop.f32.mrb[5].mxu0  ;;  %v548_v23 = vsel %vm76_vm1, %v2060_v13, 0.0  ;;  %v574_v24 = vmul.f32 %v2060_v13, %v2060_v13  ;;  %v710_v51 = vld [vmem:[#allocation7 + $0x60] sm:$0xff] }
 0x129   :  { %v1782_v12 = vadd.f32 %v491_v10, %v220_v52  ;;  %540 = vadd.xlane.f32.xlu0 %v539_v11  ;;  %v545_v19 = vsel %vm76_vm1, %v2056_v8, 0.0  ;;  %v573_v20 = vmul.f32 %v2056_v8, %v2056_v8  ;;  %v711_v52 = vld [vmem:[#allocation7 + $0x68] sm:$0xff] }
 0x12a   :  { %v528_v22 = vadd.f32 %v1781_v9, %v1454_v55  ;;  %v588_v28 = vsel %vm76_vm1, %v574_v24, 0.0 }
 0x12b   :  { %580 = vadd.xlane.f32.xlu1 %v579_v14  ;;  %v1633_v15 = vpop.f32.mrb[6].mxu0  ;;  %v527_v16 = vadd.f32 %v1782_v12, %v1454_v55  ;;  %v585_v26 = vsel %vm76_vm1, %v573_v20, 0.0 }
 0x12c   :  { %v1783_v17 = vadd.f32 %v1633_v15, %v1593_v53  ;;  %v501_v18 = vpop.f32.mrb[7].mxu0  ;;  %v2074_v27 = vmax.f32 %v528_v22, 0.0  ;;  %v2101_v53 = vpack.c.bf16 %v711_v52, %v710_v51 }
 0x12d   :  { %v1784_v21 = vadd.f32 %v501_v18, %v230_v54  ;;  %546 = vadd.xlane.f32.xlu0 %v545_v19  ;;  %v2071_v25 = vmax.f32 %v527_v16, 0.0 }
 0x12e   :  { %v530_v32 = vadd.f32 %v1783_v17, %v1454_v55  ;;  %v554_v33 = vsel %vm76_vm1, %v2074_v27, 0.0  ;;  %v576_v34 = vmul.f32 %v2074_v27, %v2074_v27  ;;  %1746 = vmatprep.subr.bf16.mxu1 %v2101_v53 }
 0x12f   :  { %549 = vadd.xlane.f32.xlu1 %v548_v23  ;;  %v529_v29 = vadd.f32 %v1784_v21, %v1454_v55  ;;  %v551_v30 = vsel %vm76_vm1, %v2071_v25, 0.0  ;;  %v575_v31 = vmul.f32 %v2071_v25, %v2071_v25 }
 0x130   :  { %v2088_v37 = vmax.f32 %v530_v32, 0.0  ;;  %v594_v38 = vsel %vm76_vm1, %v576_v34, 0.0 }
 0x131   :  { %586 = vadd.xlane.f32.xlu0 %v585_v26  ;;  %v2085_v35 = vmax.f32 %v529_v29, 0.0  ;;  %v591_v36 = vsel %vm76_vm1, %v575_v31, 0.0 }
 0x132   :  { %v560_v41 = vsel %vm76_vm1, %v2088_v37, 0.0  ;;  %v578_v42 = vmul.f32 %v2088_v37, %v2088_v37 }
 0x133   :  { %589 = vadd.xlane.f32.xlu1 %v588_v28  ;;  %v557_v39 = vsel %vm76_vm1, %v2085_v35, 0.0  ;;  %v577_v40 = vmul.f32 %v2085_v35, %v2085_v35 }
 0x134   :  { %v600_v44 = vsel %vm76_vm1, %v578_v42, 0.0 }
 0x135   :  { %552 = vadd.xlane.f32.xlu0 %v551_v30  ;;  %v597_v43 = vsel %vm76_vm1, %v577_v40, 0.0 }
 0x137   :  { %555 = vadd.xlane.f32.xlu1 %v554_v33 }
 0x139   :  { %592 = vadd.xlane.f32.xlu0 %v591_v36  ;;  %v2120_v36 = vld [vmem:[%s2359_s4] ss:$0 sm:$0xff] }
 0x13b   :  { %595 = vadd.xlane.f32.xlu1 %v594_v38 }
 0x13d   :  { %558 = vadd.xlane.f32.xlu0 %v557_v39 }
 0x13f   :  { %561 = vadd.xlane.f32.xlu1 %v560_v41 }
 0x141   :  { %598 = vadd.xlane.f32.xlu0 %v597_v43 }
 0x143   :  { %601 = vadd.xlane.f32.xlu1 %v600_v44 }
 0x1b2   :  { %v544_v54 = vpop.xlane.xlu0 %543 }
 0x1b3   :  { %v564_v55 = vmul.f32 0.03125, %v544_v54 }
 0x1b4   :  { %v584_v56 = vpop.xlane.xlu1 %583 }
 0x1b5   :  { %v612_v57 = vmul.f32 %v564_v55, %v564_v55  ;;  %v604_v58 = vmul.f32 0.03125, %v584_v56  ;;  %v636_v31 = vsub.f32 %v2045_v60, %v564_v55  ;;  %v2127_v60 = vld [vmem:[%s2360_s5] ss:$0 sm:$0xff] }
 0x1b6   :  { %v541_v59 = vpop.xlane.xlu0 %540 }
 0x1b7   :  { %v620_v62 = vsub.f32 %v604_v58, %v612_v57  ;;  %v563_v63 = vmul.f32 0.03125, %v541_v59 }
 0x1b8   :  { %v581_v1 = vpop.xlane.xlu1 %580 }
 0x1b9   :  { %v628_v2 = vmax.f32 %v620_v62, 0.0  ;;  %v611_v3 = vmul.f32 %v563_v63, %v563_v63  ;;  %v603_v4 = vmul.f32 0.03125, %v581_v1  ;;  %v635_v47 = vsub.f32 %v2047_v61, %v563_v63 }
 0x1ba   :  { %v547_v5 = vpop.xlane.xlu0 %546 }
 0x1bb   :  { %v644_v6 = vadd.f32 1e-05, %v628_v2  ;;  %v619_v7 = vsub.f32 %v603_v4, %v611_v3  ;;  %v2104_v9 = vmul.f32 0.03125, %v547_v5 }
 0x1bc   :  { %v550_v10 = vpop.xlane.xlu1 %549 }
 0x1bd   :  { %1821 = vrsqrt.f32 %v644_v6  ;;  %v627_v11 = vmax.f32 %v619_v7, 0.0  ;;  %v2106_v12 = vmul.f32 0.03125, %v550_v10  ;;  %v613_v16 = vmul.f32 %v2104_v9, %v2104_v9 }
 0x1be   :  { %v587_v14 = vpop.xlane.xlu0 %586  ;;  %v637_v4 = vsub.f32 %v2056_v8, %v2104_v9 }
 0x1bf   :  { %v643_v15 = vadd.f32 1e-05, %v627_v11  ;;  %v605_v17 = vmul.f32 0.03125, %v587_v14  ;;  %v614_v19 = vmul.f32 %v2106_v12, %v2106_v12  ;;  %v638_v14 = vsub.f32 %v2060_v13, %v2106_v12 }
 0x1c0   :  { %v590_v18 = vpop.xlane.xlu1 %589 }
 0x1c1   :  { %1823 = vrsqrt.f32 %v643_v15  ;;  %v621_v20 = vsub.f32 %v605_v17, %v613_v16  ;;  %v606_v21 = vmul.f32 0.03125, %v590_v18 }
 0x1c2   :  { %v553_v22 = vpop.xlane.xlu0 %552 }
 0x1c3   :  { %v629_v23 = vmax.f32 %v621_v20, 0.0  ;;  %v622_v24 = vsub.f32 %v606_v21, %v614_v19  ;;  %v2112_v26 = vmul.f32 0.03125, %v553_v22 }
 0x1c4   :  { %v556_v28 = vpop.xlane.xlu1 %555 }
 0x1c5   :  { %v645_v29 = vadd.f32 1e-05, %v629_v23  ;;  %v630_v30 = vmax.f32 %v622_v24, 0.0  ;;  %v2115_v32 = vmul.f32 0.03125, %v556_v28  ;;  %v615_v39 = vmul.f32 %v2112_v26, %v2112_v26  ;;  %v712_v23 = vld [vmem:[#allocation7 + $0x70] sm:$0xff]  ;;  %v713_v24 = vld [vmem:[#allocation7 + $0x78] sm:$0xff] }
 0x1c6   :  { %v593_v33 = vpop.xlane.xlu0 %592  ;;  %v639_v12 = vsub.f32 %v2071_v25, %v2112_v26 }
 0x1c7   :  { %v1822_v34 = vpop.eup %1821  ;;  %1825 = vrsqrt.f32 %v645_v29  ;;  %v646_v38 = vadd.f32 1e-05, %v630_v30  ;;  %v607_v40 = vmul.f32 0.03125, %v593_v33  ;;  %v616_v43 = vmul.f32 %v2115_v32, %v2115_v32 }
 0x1c8   :  { %v660_v41 = vmul.f32 %v1822_v34, %v636_v31  ;;  %v596_v42 = vpop.xlane.xlu1 %595  ;;  %v1749_v31 = vpack.c.bf16 %v713_v24, %v712_v23  ;;  %v640_v33 = vsub.f32 %v2074_v27, %v2115_v32 }
 0x1c9   :  { %1827 = vrsqrt.f32 %v646_v38  ;;  %v623_v44 = vsub.f32 %v607_v40, %v615_v39  ;;  %v608_v45 = vmul.f32 0.03125, %v596_v42  ;;  %v994_v39 = vld [vmem:[#allocation7 + $0xa0] sm:$0xff]  ;;  %v995_v40 = vld [vmem:[#allocation7 + $0xa8] sm:$0xff] }
 0x1ca   :  { %v673_v46 = vmul.f32 %v2120_v36, %v660_v41  ;;  %v559_v48 = vpop.xlane.xlu0 %558  ;;  %v1753_v42 = vpack.c.bf16 %v995_v40, %v994_v39 }
 0x1cb   :  { %v1824_v49 = vpop.eup %1823  ;;  %v631_v50 = vmax.f32 %v623_v44, 0.0  ;;  %v624_v51 = vsub.f32 %v608_v45, %v616_v43  ;;  %v2133_v52 = vmul.f32 0.03125, %v559_v48 }
 0x1cc   :  { %v686_v54 = vadd.f32 %v2127_v60, %v673_v46  ;;  %v659_v55 = vmul.f32 %v1824_v49, %v635_v47  ;;  %v562_v56 = vpop.xlane.xlu1 %561 }
 0x1cd   :  { %v647_v57 = vadd.f32 1e-05, %v631_v50  ;;  %v632_v58 = vmax.f32 %v624_v51, 0.0  ;;  %v2138_v62 = vmul.f32 0.03125, %v562_v56  ;;  %v617_v63 = vmul.f32 %v2133_v52, %v2133_v52 }
 0x1ce   :  { %694 = vst.msk [vmem:[#allocation2 + $0x9] sm:$0xff] %vm76_vm1, %v686_v54  ;;  %v672_v59 = vmul.f32 %v2120_v36, %v659_v55  ;;  %v599_v1 = vpop.xlane.xlu0 %598  ;;  %v641_v45 = vsub.f32 %v2085_v35, %v2133_v52 }
 0x1cf   :  { %1829 = vrsqrt.f32 %v647_v57  ;;  %v648_v61 = vadd.f32 1e-05, %v632_v58  ;;  %v609_v2 = vmul.f32 0.03125, %v599_v1  ;;  %v618_v7 = vmul.f32 %v2138_v62, %v2138_v62  ;;  %v996_v58 = vld [vmem:[#allocation7 + $0xb0] sm:$0xff] }
 0x1d0   :  { %v685_v3 = vadd.f32 %v2127_v60, %v672_v59  ;;  %v602_v5 = vpop.xlane.xlu1 %601  ;;  %v997_v59 = vld [vmem:[#allocation7 + $0xb8] sm:$0xff] }
 0x1d1   :  { %v1826_v6 = vpop.eup %1825  ;;  %1831 = vrsqrt.f32 %v648_v61  ;;  %v625_v10 = vsub.f32 %v609_v2, %v617_v63  ;;  %v610_v11 = vmul.f32 0.03125, %v602_v5 }
 0x1d2   :  { %693 = vst.msk [vmem:[#allocation2 + $0x1] sm:$0xff] %vm76_vm1, %v685_v3  ;;  %v661_v15 = vmul.f32 %v1826_v6, %v637_v4 }
 0x1d3   :  { %v1828_v16 = vpop.eup %1827  ;;  %v633_v17 = vmax.f32 %v625_v10, 0.0  ;;  %v626_v18 = vsub.f32 %v610_v11, %v618_v7 }
 0x1d4   :  { %v674_v19 = vmul.f32 %v2120_v36, %v661_v15  ;;  %v662_v8 = vmul.f32 %v1828_v16, %v638_v14 }
 0x1d5   :  { %v649_v9 = vadd.f32 1e-05, %v633_v17  ;;  %v634_v20 = vmax.f32 %v626_v18, 0.0  ;;  %v715_v38 = vld [vmem:[#allocation2 + $0x9] sm:$0xff]  ;;  %v1481_v17 = vld [vmem:[%s2358_s3 + $0x1] ss:$0 sm:$0xff] }
 0x1d6   :  { %v687_v21 = vadd.f32 %v2127_v60, %v674_v19  ;;  %v675_v22 = vmul.f32 %v2120_v36, %v662_v8  ;;  %v986_v6 = vld [vmem:[#allocation2 + $0xa] sm:$0xff] }
 0x1d7   :  { %1833 = vrsqrt.f32 %v649_v9  ;;  %v650_v28 = vadd.f32 1e-05, %v634_v20 }
 0x1d8   :  { %695 = vst.msk [vmem:[#allocation2 + $0x19] sm:$0xff] %vm76_vm1, %v687_v21  ;;  %v688_v13 = vadd.f32 %v2127_v60, %v675_v22 }
 0x1d9   :  { %v1830_v29 = vpop.eup %1829  ;;  %1835 = vrsqrt.f32 %v650_v28  ;;  %v714_v30 = vld [vmem:[#allocation2 + $0x1] sm:$0xff] }
 0x1da   :  { %696 = vst.msk [vmem:[#allocation2 + $0x21] sm:$0xff] %vm76_vm1, %v688_v13  ;;  %v663_v34 = vmul.f32 %v1830_v29, %v639_v12  ;;  %1642 = vmatprep.mubr.msk.f32.mxu1 %vm76_vm1, %v714_v30  ;;  %v985_v5 = vld [vmem:[#allocation2 + $0x2] sm:$0xff] }
 0x1db   :  { %v1832_v41 = vpop.eup %1831  ;;  %1643 = vmatmul.mubr.msk.f32.vlgmr.msra.gmra.mrb[4].mxu1 %vm76_vm1, %v715_v38 }
 0x1dc   :  { %v676_v25 = vmul.f32 %v2120_v36, %v663_v34  ;;  %v664_v26 = vmul.f32 %v1832_v41, %v640_v33  ;;  %1748 = vmatpush3.bf16.msra.mxu1 %v2101_v53  ;;  %v642_v53 = vsub.f32 %v2088_v37, %v2138_v62  ;;  %v1757_v62 = vpack.c.bf16 %v997_v59, %v996_v58 }
 0x1dd   :  { %1750 = vmatprep.subr.bf16.mxu1 %v1749_v31 }
 0x1de   :  { %v689_v43 = vadd.f32 %v2127_v60, %v676_v25  ;;  %v677_v27 = vmul.f32 %v2120_v36, %v664_v26 }
 0x1df   :  { %v716_v32 = vld [vmem:[#allocation2 + $0x19] sm:$0xff] }
 0x1e0   :  { %697 = vst.msk [vmem:[#allocation2 + $0x31] sm:$0xff] %vm76_vm1, %v689_v43  ;;  %v690_v44 = vadd.f32 %v2127_v60, %v677_v27  ;;  %1645 = vmatprep.mubr.msk.f32.mxu1 %vm76_vm1, %v716_v32  ;;  %1752 = vmatpush3.bf16.msra.mxu1 %v1749_v31  ;;  %v703_v1 = vld [vmem:[#allocation2 + $0x18] sm:$0xff] }
 0x1e1   :  { %v1834_v46 = vpop.eup %1833  ;;  %v717_v47 = vld [vmem:[#allocation2 + $0x21] sm:$0xff]  ;;  %1754 = vmatprep.subr.bf16.mxu1 %v1753_v42 }
 0x1e2   :  { %698 = vst.msk [vmem:[#allocation2 + $0x39] sm:$0xff] %vm76_vm1, %v690_v44  ;;  %v665_v48 = vmul.f32 %v1834_v46, %v641_v45  ;;  %1646 = vmatmul.mubr.msk.f32.gmra.mrb[6].mxu1 %vm76_vm1, %v717_v47  ;;  %v704_v61 = vld [vmem:[#allocation2 + $0x20] sm:$0xff] }
 0x1e3   :  { %v1836_v49 = vpop.eup %1835  ;;  %v987_v7 = vld [vmem:[#allocation2 + $0x1a] sm:$0xff]  ;;  %v988_v10 = vld [vmem:[#allocation2 + $0x22] sm:$0xff] }
 0x1e4   :  { %v678_v50 = vmul.f32 %v2120_v36, %v665_v48  ;;  %v666_v51 = vmul.f32 %v1836_v49, %v642_v53 }
 0x1e6   :  { %v691_v35 = vadd.f32 %v2127_v60, %v678_v50  ;;  %v679_v52 = vmul.f32 %v2120_v36, %v666_v51  ;;  %v701_v36 = vld [vmem:[#allocation2] sm:$0xff] }
 0x1e7   :  { %v718_v54 = vld [vmem:[#allocation2 + $0x31] sm:$0xff] }
 0x1e8   :  { %699 = vst.msk [vmem:[#allocation2 + $0x49] sm:$0xff] %vm76_vm1, %v691_v35  ;;  %v692_v55 = vadd.f32 %v2127_v60, %v679_v52  ;;  %1648 = vmatprep.mubr.msk.f32.mxu1 %vm76_vm1, %v718_v54  ;;  %v702_v60 = vld [vmem:[#allocation2 + $0x8] sm:$0xff]  ;;  %v705_v63 = vld [vmem:[#allocation2 + $0x30] sm:$0xff] }
 0x1e9   :  { %v719_v56 = vld [vmem:[#allocation2 + $0x39] sm:$0xff] }
 0x1ea   :  { %700 = vst.msk [vmem:[#allocation2 + $0x51] sm:$0xff] %vm76_vm1, %v692_v55  ;;  %1649 = vmatmul.mubr.msk.f32.gmra.mrb[8].mxu1 %vm76_vm1, %v719_v56  ;;  %v706_v2 = vld [vmem:[#allocation2 + $0x38] sm:$0xff] }
 0x1eb   :  { %v989_v11 = vld [vmem:[#allocation2 + $0x32] sm:$0xff]  ;;  %v990_v14 = vld [vmem:[#allocation2 + $0x3a] sm:$0xff] }
 0x1ef   :  { %v720_v37 = vld [vmem:[#allocation2 + $0x49] sm:$0xff] }
 0x1f0   :  { %1651 = vmatprep.mubr.msk.f32.mxu1 %vm76_vm1, %v720_v37  ;;  %v707_v3 = vld [vmem:[#allocation2 + $0x48] sm:$0xff] }
 0x1f1   :  { %v721_v57 = vld [vmem:[#allocation2 + $0x51] sm:$0xff] }
 0x1f2   :  { %1652 = vmatmul.mubr.msk.f32.gmra.mrb[10].mxu1 %vm76_vm1, %v721_v57  ;;  %v708_v4 = vld [vmem:[#allocation2 + $0x50] sm:$0xff] }
 0x1f3   :  { %1662 = vmatprep.mubr.msk.f32.mxu1 %vm76_vm1, %v701_v36  ;;  %v991_v15 = vld [vmem:[#allocation2 + $0x4a] sm:$0xff]  ;;  %v992_v16 = vld [vmem:[#allocation2 + $0x52] sm:$0xff] }
 0x1f6   :  { %1663 = vmatmul.mubr.msk.f32.vlgmr.msra.gmra.mrb[4].mxu1 %vm76_vm1, %v702_v60 }
 0x1f7   :  { %1665 = vmatprep.mubr.msk.f32.mxu1 %vm76_vm1, %v703_v1  ;;  %1756 = vmatpush3.bf16.msra.mxu1 %v1753_v42  ;;  %v1930_v1 = vmov 0.0|0.0  }
 0x1f8   :  { %1758 = vmatprep.subr.bf16.mxu1 %v1757_v62  ;;  %1761 = vmatprep.subr.bf16.mxu0 %v1930_v1 }
 0x1fa   :  { %1666 = vmatmul.mubr.msk.f32.gmra.mrb[6].mxu1 %vm76_vm1, %v704_v61 }
 0x1fb   :  { %1668 = vmatprep.mubr.msk.f32.mxu1 %vm76_vm1, %v705_v63  ;;  %1760 = vmatpush3.bf16.msra.mxu1 %v1757_v62 }
 0x1fe   :  { %1669 = vmatmul.mubr.msk.f32.gmra.mrb[8].mxu1 %vm76_vm1, %v706_v2 }
 0x1ff   :  { %1671 = vmatprep.mubr.msk.f32.mxu1 %vm76_vm1, %v707_v3 }
 0x202   :  { %1672 = vmatmul.mubr.msk.f32.gmra.mrb[10].mxu1 %vm76_vm1, %v708_v4 }
 0x203   :  { %1682 = vmatprep.mubr.msk.f32.mxu1 %vm76_vm1, %v985_v5 }
 0x206   :  { %1683 = vmatmul.mubr.msk.f32.vlgmr.msra.gmra.mrb[4].mxu1 %vm76_vm1, %v986_v6 }
 0x207   :  { %1685 = vmatprep.mubr.msk.f32.mxu1 %vm76_vm1, %v987_v7 }
 0x20a   :  { %1686 = vmatmul.mubr.msk.f32.gmra.mrb[6].mxu1 %vm76_vm1, %v988_v10 }
 0x20b   :  { %1688 = vmatprep.mubr.msk.f32.mxu1 %vm76_vm1, %v989_v11 }
 0x20e   :  { %1689 = vmatmul.mubr.msk.f32.gmra.mrb[8].mxu1 %vm76_vm1, %v990_v14 }
 0x20f   :  { %1691 = vmatprep.mubr.msk.f32.mxu1 %vm76_vm1, %v991_v15 }
 0x212   :  { %1692 = vmatmul.mubr.msk.f32.gmra.mrb[10].mxu1 %vm76_vm1, %v992_v16 }
 0x2d9   :  { %v1684_v18 = vpop.f32.mrb[4].mxu1 }
 0x2da   :  { %v1141_v19 = vadd.f32 %v1684_v18, %v1481_v17  ;;  %v1088_v8 = vpop.f32.mrb[5].mxu1 }
 0x2db   :  { %v1140_v9 = vadd.f32 %v1481_v17, %v1088_v8 }
 0x2dc   :  { %v2204_v20 = vmax.f32 %v1141_v19, 0.0 }
 0x2dd   :  { %v2206_v21 = vmax.f32 %v1140_v9, 0.0  ;;  %v1687_v22 = vpop.f32.mrb[6].mxu1 }
 0x2de   :  { %v1143_v23 = vadd.f32 %v1687_v22, %v1481_v17  ;;  %v1098_v24 = vpop.f32.mrb[7].mxu1  ;;  %v1159_v28 = vsel %vm76_vm1, %v2204_v20, 0.0  ;;  %v1189_v13 = vmul.f32 %v2204_v20, %v2204_v20 }
 0x2df   :  { %v1142_v12 = vadd.f32 %v1481_v17, %v1098_v24  ;;  %1160 = vadd.xlane.f32.xlu1 %v1159_v28  ;;  %v1156_v29 = vsel %vm76_vm1, %v2206_v21, 0.0  ;;  %v1188_v30 = vmul.f32 %v2206_v21, %v2206_v21 }
 0x2e0   :  { %1157 = vadd.xlane.f32.xlu0 %v1156_v29  ;;  %v2216_v33 = vmax.f32 %v1143_v23, 0.0  ;;  %v1199_v38 = vsel %vm76_vm1, %v1189_v13, 0.0 }
 0x2e1   :  { %v1690_v31 = vpop.f32.mrb[8].mxu1  ;;  %v2219_v39 = vmax.f32 %v1142_v12, 0.0  ;;  %v1196_v40 = vsel %vm76_vm1, %v1188_v30, 0.0 }
 0x2e2   :  { %v1108_v34 = vpop.f32.mrb[9].mxu1  ;;  %v1145_v25 = vadd.f32 %v1690_v31, %v1481_v17  ;;  %v1165_v42 = vsel %vm76_vm1, %v2216_v33, 0.0  ;;  %v1191_v43 = vmul.f32 %v2216_v33, %v2216_v33 }
 0x2e3   :  { %1200 = vadd.xlane.f32.xlu1 %v1199_v38  ;;  %v1144_v27 = vadd.f32 %v1481_v17, %v1108_v34  ;;  %v1162_v32 = vsel %vm76_vm1, %v2219_v39, 0.0  ;;  %v1190_v44 = vmul.f32 %v2219_v39, %v2219_v39 }
 0x2e4   :  { %1197 = vadd.xlane.f32.xlu0 %v1196_v40  ;;  %v2230_v45 = vmax.f32 %v1145_v25, 0.0  ;;  %v1205_v46 = vsel %vm76_vm1, %v1191_v43, 0.0 }
 0x2e5   :  { %v1693_v41 = vpop.f32.mrb[10].mxu1  ;;  %v2233_v47 = vmax.f32 %v1144_v27, 0.0  ;;  %v1202_v53 = vsel %vm76_vm1, %v1190_v44, 0.0 }
 0x2e6   :  { %v1118_v26 = vpop.f32.mrb[11].mxu1  ;;  %v1147_v48 = vadd.f32 %v1693_v41, %v1481_v17  ;;  %v1171_v49 = vsel %vm76_vm1, %v2230_v45, 0.0  ;;  %v1193_v50 = vmul.f32 %v2230_v45, %v2230_v45 }
 0x2e7   :  { %1166 = vadd.xlane.f32.xlu1 %v1165_v42  ;;  %v1146_v51 = vadd.f32 %v1481_v17, %v1118_v26  ;;  %v1168_v35 = vsel %vm76_vm1, %v2233_v47, 0.0  ;;  %v1192_v52 = vmul.f32 %v2233_v47, %v2233_v47 }
 0x2e8   :  { %1163 = vadd.xlane.f32.xlu0 %v1162_v32  ;;  %v2244_v54 = vmax.f32 %v1147_v48, 0.0  ;;  %v1211_v55 = vsel %vm76_vm1, %v1193_v50, 0.0 }
 0x2e9   :  { %v2247_v56 = vmax.f32 %v1146_v51, 0.0  ;;  %v1208_v37 = vsel %vm76_vm1, %v1192_v52, 0.0  ;;  %v2283_v52 = vld [vmem:[%s2359_s4 + $0x1] ss:$0 sm:$0xff] }
 0x2ea   :  { %v1177_v57 = vsel %vm76_vm1, %v2244_v54, 0.0  ;;  %v1195_v58 = vmul.f32 %v2244_v54, %v2244_v54 }
 0x2eb   :  { %1206 = vadd.xlane.f32.xlu1 %v1205_v46  ;;  %v1174_v59 = vsel %vm76_vm1, %v2247_v56, 0.0  ;;  %v1194_v36 = vmul.f32 %v2247_v56, %v2247_v56 }
 0x2ec   :  { %1203 = vadd.xlane.f32.xlu0 %v1202_v53  ;;  %v1217_v62 = vsel %vm76_vm1, %v1195_v58, 0.0 }
 0x2ed   :  { %v1214_v60 = vsel %vm76_vm1, %v1194_v36, 0.0 }
 0x2ef   :  { %1172 = vadd.xlane.f32.xlu1 %v1171_v49 }
 0x2f0   :  { %1169 = vadd.xlane.f32.xlu0 %v1168_v35 }
 0x2f3   :  { %1212 = vadd.xlane.f32.xlu1 %v1211_v55 }
 0x2f4   :  { %1209 = vadd.xlane.f32.xlu0 %v1208_v37 }
 0x2f7   :  { %1178 = vadd.xlane.f32.xlu1 %v1177_v57 }
 0x2f8   :  { %1175 = vadd.xlane.f32.xlu0 %v1174_v59 }
 0x2fb   :  { %1218 = vadd.xlane.f32.xlu1 %v1217_v62 }
 0x2fc   :  { %1215 = vadd.xlane.f32.xlu0 %v1214_v60  ;;  %v2288_v60 = vld [vmem:[%s2360_s5 + $0x1] ss:$0 sm:$0xff] }
 0x36c   :  { %v1161_v61 = vpop.xlane.xlu1 %1160 }
 0x36d   :  { %v1181_v63 = vmul.f32 0.03125, %v1161_v61  ;;  %v1158_v2 = vpop.xlane.xlu0 %1157 }
 0x36e   :  { %v1180_v3 = vmul.f32 0.03125, %v1158_v2 }
 0x36f   :  { %v1229_v5 = vmul.f32 %v1181_v63, %v1181_v63  ;;  %v1253_v53 = vsub.f32 %v2204_v20, %v1181_v63 }
 0x370   :  { %v1201_v4 = vpop.xlane.xlu1 %1200  ;;  %v1228_v10 = vmul.f32 %v1180_v3, %v1180_v3  ;;  %v1252_v51 = vsub.f32 %v2206_v21, %v1180_v3 }
 0x371   :  { %v1221_v6 = vmul.f32 0.03125, %v1201_v4  ;;  %v1198_v7 = vpop.xlane.xlu0 %1197 }
 0x372   :  { %v1220_v11 = vmul.f32 0.03125, %v1198_v7 }
 0x373   :  { %v1237_v14 = vsub.f32 %v1221_v6, %v1229_v5 }
 0x374   :  { %v1236_v15 = vsub.f32 %v1220_v11, %v1228_v10  ;;  %v1167_v16 = vpop.xlane.xlu1 %1166 }
 0x375   :  { %v1245_v17 = vmax.f32 %v1237_v14, 0.0  ;;  %v2262_v18 = vmul.f32 0.03125, %v1167_v16  ;;  %v1164_v19 = vpop.xlane.xlu0 %1163 }
 0x376   :  { %v1244_v8 = vmax.f32 %v1236_v15, 0.0  ;;  %v2264_v9 = vmul.f32 0.03125, %v1164_v19 }
 0x377   :  { %v1261_v0 = vadd.f32 1e-05, %v1245_v17  ;;  %v1231_v24 = vmul.f32 %v2262_v18, %v2262_v18  ;;  %v1255_v15 = vsub.f32 %v2216_v33, %v2262_v18 }
 0x378   :  { %v1260_v22 = vadd.f32 1e-05, %v1244_v8  ;;  %v1207_v23 = vpop.xlane.xlu1 %1206  ;;  %v1230_v12 = vmul.f32 %v2264_v9, %v2264_v9 }
 0x379   :  { %1837 = vrsqrt.f32 %v1261_v0  ;;  %v1223_v28 = vmul.f32 0.03125, %v1207_v23  ;;  %v1204_v13 = vpop.xlane.xlu0 %1203  ;;  %v1254_v0 = vsub.f32 %v2219_v39, %v2264_v9 }
 0x37a   :  { %1839 = vrsqrt.f32 %v1260_v22  ;;  %v1222_v29 = vmul.f32 0.03125, %v1204_v13 }
 0x37b   :  { %v1239_v30 = vsub.f32 %v1223_v28, %v1231_v24 }
 0x37c   :  { %v1238_v31 = vsub.f32 %v1222_v29, %v1230_v12  ;;  %v1173_v34 = vpop.xlane.xlu1 %1172 }
 0x37d   :  { %v1247_v38 = vmax.f32 %v1239_v30, 0.0  ;;  %v2270_v40 = vmul.f32 0.03125, %v1173_v34  ;;  %v1170_v41 = vpop.xlane.xlu0 %1169 }
 0x37e   :  { %v1246_v25 = vmax.f32 %v1238_v31, 0.0  ;;  %v2272_v26 = vmul.f32 0.03125, %v1170_v41 }
 0x37f   :  { %v1263_v42 = vadd.f32 1e-05, %v1247_v38  ;;  %v1233_v32 = vmul.f32 %v2270_v40, %v2270_v40  ;;  %v1257_v38 = vsub.f32 %v2230_v45, %v2270_v40 }
 0x380   :  { %v1262_v43 = vadd.f32 1e-05, %v1246_v25  ;;  %v1213_v27 = vpop.xlane.xlu1 %1212  ;;  %v1232_v48 = vmul.f32 %v2272_v26, %v2272_v26  ;;  %v1256_v25 = vsub.f32 %v2233_v47, %v2272_v26 }
 0x381   :  { %1841 = vrsqrt.f32 %v1263_v42  ;;  %v1225_v44 = vmul.f32 0.03125, %v1213_v27  ;;  %v1210_v46 = vpop.xlane.xlu0 %1209 }
 0x382   :  { %1843 = vrsqrt.f32 %v1262_v43  ;;  %v1224_v49 = vmul.f32 0.03125, %v1210_v46 }
 0x383   :  { %v1838_v50 = vpop.eup %1837  ;;  %v1241_v35 = vsub.f32 %v1225_v44, %v1233_v32 }
 0x384   :  { %v1840_v55 = vpop.eup %1839  ;;  %v1277_v37 = vmul.f32 %v1838_v50, %v1253_v53  ;;  %v1240_v57 = vsub.f32 %v1224_v49, %v1232_v48  ;;  %v1179_v58 = vpop.xlane.xlu1 %1178 }
 0x385   :  { %v1276_v59 = vmul.f32 %v1840_v55, %v1252_v51  ;;  %v1249_v20 = vmax.f32 %v1241_v35, 0.0  ;;  %v1187_v36 = vmul.f32 0.03125, %v1179_v58  ;;  %v1176_v62 = vpop.xlane.xlu0 %1175 }
 0x386   :  { %v1248_v21 = vmax.f32 %v1240_v57, 0.0  ;;  %v1186_v61 = vmul.f32 0.03125, %v1176_v62  ;;  %v1290_v63 = vmul.f32 %v2283_v52, %v1277_v37 }
 0x387   :  { %v1265_v2 = vadd.f32 1e-05, %v1249_v20  ;;  %v1289_v3 = vmul.f32 %v2283_v52, %v1276_v59  ;;  %v1235_v7 = vmul.f32 %v1187_v36, %v1187_v36  ;;  %v1259_v53 = vsub.f32 %v2244_v54, %v1187_v36 }
 0x388   :  { %v1264_v4 = vadd.f32 1e-05, %v1248_v21  ;;  %v1219_v5 = vpop.xlane.xlu1 %1218  ;;  %v1303_v6 = vadd.f32 %v2288_v60, %v1290_v63  ;;  %v1234_v16 = vmul.f32 %v1186_v61, %v1186_v61  ;;  %v1258_v26 = vsub.f32 %v2247_v56, %v1186_v61  ;;  %v1310_v56 = vld [vmem:[%s2361_s6] sm:$0x1]  ;;  %s1897_s6 = scalar_lea.vmem %s1421_s23, 16 }
 0x389   :  { %1845 = vrsqrt.f32 %v1265_v2  ;;  %v1227_v10 = vmul.f32 0.03125, %v1219_v5  ;;  %v1216_v11 = vpop.xlane.xlu0 %1215  ;;  %v1302_v14 = vadd.f32 %v2288_v60, %v1289_v3  ;;  %p1898_p2 = scmp.ne.s32.totalorder %s1421_s23, %s1897_s6  ;;  %p1903_p4 = scmp.lt.s32.totalorder %s1901_s24, %s1897_s6 }
 0x38a   :  { %1847 = vrsqrt.f32 %v1264_v4  ;;  %v1226_v17 = vmul.f32 0.03125, %v1216_v11 }
 0x38b   :  { %v1842_v8 = vpop.eup %1841  ;;  %v1243_v22 = vsub.f32 %v1227_v10, %v1235_v7  ;;  %v1762_v23 = vpack.c.bf16 %v1303_v6, %v1302_v14  ;;  %p1904_p5 = por %p1903_p4, %p1902_p3 }
 0x38c   :  { %v1844_v24 = vpop.eup %1843  ;;  %v1279_v28 = vmul.f32 %v1842_v8, %v1255_v15  ;;  %v1242_v13 = vsub.f32 %v1226_v17, %v1234_v16 }
 0x38d   :  { %v1278_v12 = vmul.f32 %v1844_v24, %v1254_v0  ;;  %v1251_v33 = vmax.f32 %v1243_v22, 0.0  ;;  %1764 = vmatpush3.bf16.xpose.msk.msra.mxu0 %vm2298_vm3, %v1762_v23  ;;  %p1905_p6 = pnand %p1904_p5, %p1898_p2 }
 0x38e   :  { %v1250_v18 = vmax.f32 %v1242_v13, 0.0  ;;  %1765 = vmatprep.subr.bf16.mxu0 %v1930_v1  ;;  %v1292_v29 = vmul.f32 %v2283_v52, %v1279_v28 }
 0x38f   :  { %v1267_v30 = vadd.f32 1e-05, %v1251_v33  ;;  %v1291_v31 = vmul.f32 %v2283_v52, %v1278_v12 }
 0x390   :  { %v1266_v34 = vadd.f32 1e-05, %v1250_v18  ;;  %v1305_v39 = vadd.f32 %v2288_v60, %v1292_v29 }
 0x391   :  { %1849 = vrsqrt.f32 %v1267_v30  ;;  %v1304_v9 = vadd.f32 %v2288_v60, %v1291_v31 }
 0x392   :  { %1851 = vrsqrt.f32 %v1266_v34 }
 0x393   :  { %v1846_v41 = vpop.eup %1845  ;;  %v1766_v42 = vpack.c.bf16 %v1305_v39, %v1304_v9 }
 0x394   :  { %v1848_v43 = vpop.eup %1847  ;;  %v1281_v27 = vmul.f32 %v1846_v41, %v1257_v38 }
 0x395   :  { %v1280_v32 = vmul.f32 %v1848_v43, %v1256_v25  ;;  %1768 = vmatpush3.bf16.xpose.msk.msra.mxu0 %vm2298_vm3, %v1766_v42 }
 0x396   :  { %1769 = vmatprep.subr.bf16.mxu0 %v1930_v1  ;;  %v1294_v44 = vmul.f32 %v2283_v52, %v1281_v27 }
 0x397   :  { %v1293_v46 = vmul.f32 %v2283_v52, %v1280_v32 }
 0x398   :  { %v1307_v45 = vadd.f32 %v2288_v60, %v1294_v44 }
 0x399   :  { %v1306_v40 = vadd.f32 %v2288_v60, %v1293_v46 }
 0x39b   :  { %v1850_v47 = vpop.eup %1849  ;;  %v1770_v48 = vpack.c.bf16 %v1307_v45, %v1306_v40 }
 0x39c   :  { %v1852_v49 = vpop.eup %1851  ;;  %v1283_v50 = vmul.f32 %v1850_v47, %v1259_v53 }
 0x39d   :  { %v1282_v51 = vmul.f32 %v1852_v49, %v1258_v26  ;;  %1772 = vmatpush3.bf16.xpose.msk.msra.mxu0 %vm2298_vm3, %v1770_v48 }
 0x39e   :  { %1773 = vmatprep.subr.bf16.mxu0 %v1930_v1  ;;  %v1296_v35 = vmul.f32 %v2283_v52, %v1283_v50  ;;  %v1312_v1 = vstv %s2362_s7 }
 0x39f   :  { %v1295_v55 = vmul.f32 %v2283_v52, %v1282_v51  ;;  %v1410_v52 = vld [vmem:[%s2356_s1] sm:$0x1] }
 0x3a0   :  { %v1309_v37 = vadd.f32 %v2288_v60, %v1296_v35 }
 0x3a1   :  { %v1308_v54 = vadd.f32 %v2288_v60, %v1295_v55 }
 0x3a3   :  { %v1774_v57 = vpack.c.bf16 %v1309_v37, %v1308_v54 }
 0x3a5   :  { %1776 = vmatpush3.bf16.xpose.msk.msra.mxu0 %vm2298_vm3, %v1774_v57 }
 0x3ac   :  { %1711 = vmatmul.mubr.msk.f32.vlgmr.msra.gmra.mrb[8].mxu0 %vm76_vm1, %v1310_v56 }
 0x47f   :  { %v1406_v58 = vpop.f32.mrb[8].mxu0 }
 0x480   :  { %v1407_v59 = vadd.f32 %v1406_v58, %v1312_v1  ;;  %v1712_v20 = vpop.f32.mrb[9].mxu0 }
 0x482   :  { %v1411_v36 = vmul.f32 %v1410_v52, %v1407_v59 }
 0x484   :  { %1413 = vst.msk [vmem:[#allocation9] sm:$0x1] %vm1412_vm4, %v1411_v36 }
 0x485   :  { %1908 = shalt.err (!%p1905_p6)
}
 0x486   :  { %s1909_s1 = scalar_lea.hbm %s2363_s8, 16 }
 0x487   :  { %p1910_p7 = scmp.ne.s32.totalorder %s2363_s8, %s1909_s1  ;;  %p1913_p8 = scmp.lt.u32.totalorder %s1909_s1, %s2363_s8 }
 0x489   :  { %p1915_p9 = pnand %p1913_p8, %p1910_p7 }
 0x48b   :  { %1918 = shalt.err (!%p1915_p9)
}
 0x48c   :  { %1423 = dma.vmem_to_hbm [thread:$0]  %s1421_s23, 16, %s2363_s8, [#allocation6]  }
 0x48d   :  { %1923 = dma.done.wait [#allocation6], 16  }
 0x48e   :  { %1924 = vsyncadd [#allocation6], 4294967280 }
 0x48f   :  { %1427 = vsyncpa [#allocation5], 1 }
 0x490   :  { %1428 = vsyncpa [#allocation8], 1 }
 0x491   :  { %1429 = vsyncpa [#allocation6], 1 }

</bundles_post_ra>
